<compile_context>
chip_gen: v5e
topology: v5e:2x2
jax: 0.10.0
libtpu: 0.0.40
codegen_flags: <defaults>
</compile_context>

<pallas_src>
import jax
import jax.numpy as jnp
from jax import lax
from jax.experimental import pallas as pl
from jax.experimental.pallas import tpu as pltpu


# ----------------------------------------------------------------------------
# helpers
# ----------------------------------------------------------------------------
def _round_up(x, m):
    return ((x + m - 1) // m) * m


def _pad_axis(x, axis, target):
    pad = target - x.shape[axis]
    if pad <= 0:
        return x
    widths = [(0, 0)] * x.ndim
    widths[axis] = (0, pad)
    return jnp.pad(x, widths)


def _pad_gates(w, h, hp):
    """Pad the trailing 4*h gate axis (i,f,g,o blocks) to 4*hp, block-wise."""
    lead = w.shape[:-1]
    w4 = w.reshape(lead + (4, h))
    w4 = jnp.pad(w4, [(0, 0)] * len(lead) + [(0, 0), (0, hp - h)])
    return w4.reshape(lead + (4 * hp,))


# ----------------------------------------------------------------------------
# Tiled matmul + bias kernel.  Used for:
#   * the encoder conv-as-matmul
#   * the hoisted W(features)+b attention projection
#   * the precomputed embedding->gate contribution
#   * the deferred (T*Bp, Hp) x (Hp, Vp) vocab projection
# All four are grid-parallel (shard across both TCs on v7x).
# ----------------------------------------------------------------------------
def _matmul_bias_kernel(x_ref, w_ref, b_ref, o_ref):
    acc = jnp.dot(x_ref[...], w_ref[...], preferred_element_type=jnp.float32)
    o_ref[...] = (acc + b_ref[...]).astype(o_ref.dtype)


def matmul_bias(x, w, b, *, out_dtype=jnp.float32):
    M, K = x.shape
    N = w.shape[1]
    # 256-wide N tiles fill the v6e/v7x MXU pass; fall back to 128 (v5e width).
    if N % 128 == 0:
        tn = 256 if N % 256 == 0 else 128
    else:
        tn = N
    # Tile M when large so the LHS block + double-buffered RHS/output tiles
    # stay inside v5e's smaller default scoped-VMEM limit.
    tm = 256 if (M > 256 and M % 256 == 0) else M
    grid = (M // tm, N // tn)
    return pl.pallas_call(
        _matmul_bias_kernel,
        out_shape=jax.ShapeDtypeStruct((M, N), out_dtype),
        grid_spec=pltpu.PrefetchScalarGridSpec(
            num_scalar_prefetch=0,
            grid=grid,
            in_specs=[pl.BlockSpec((tm, K), lambda i, j: (i, 0)),
                      pl.BlockSpec((K, tn), lambda i, j: (0, j)),
                      pl.BlockSpec((1, tn), lambda i, j: (0, j))],
            out_specs=pl.BlockSpec((tm, tn), lambda i, j: (i, j)),
        ),
        compiler_params=pltpu.CompilerParams(
            dimension_semantics=("parallel", "parallel")),
    )(x, w, b)


# ----------------------------------------------------------------------------
# Recurrent decoder kernel: only the inherently-serial math stays in-kernel
# (attention score/softmax/context + LSTMCell).  Emits per-step hidden states;
# the vocab projection is deferred to a big tiled matmul outside.
# ----------------------------------------------------------------------------
def _decoder_kernel(embg_ref, feat_ref, wf_ref,
                    uw_ref, ub_ref, vrow_ref,
                    wic_ref, whh_ref,
                    hid_ref):
    T = hid_ref.shape[0]
    Bp = hid_ref.shape[1]
    Hp = hid_ref.shape[2]

    # Only the tiny (1, Ap) vectors are hoisted; the large blocks (features,
    # wf, weight slabs, embedding gates) are indexed at their use sites so no
    # big SSA values stay live across the loop.
    ub = ub_ref[...]                                 # (1, Ap) f32
    vrow = vrow_ref[...]                             # (1, Ap) f32

    def step(t, carry):
        hidden, cell = carry                         # (Bp, Hp) f32 each
        h_bf = hidden.astype(jnp.bfloat16)

        # --- Bahdanau attention (W(features)+b precomputed once as wf_ref) --
        uh = jnp.dot(h_bf, uw_ref[...],
                     preferred_element_type=jnp.float32) + ub    # (Bp, Ap)
        # wf is bf16; the add promotes to f32 per element (no resident f32 copy).
        score = jnp.tanh(wf_ref[...] + uh[:, None, :])           # (Bp, L, Ap)
        # v-projection as VPU multiply + lane reduction; v bias omitted since
        # softmax over L is shift-invariant to a constant.
        attn = jnp.sum(score * vrow[None, :, :], axis=-1)        # (Bp, L)
        attn = attn - jnp.max(attn, axis=1, keepdims=True)
        e = jnp.exp(attn)
        alpha = e * pl.reciprocal(jnp.sum(e, axis=1, keepdims=True),
                                  approx=True)
        # bf16 features * f32 alpha promotes per element; no f32 feature copy.
        context = jnp.sum(feat_ref[...] * alpha[:, :, None], axis=1)  # (Bp, Fp)

        # --- LSTMCell (gate order i, f, g, o) -------------------------------
        # emb @ W_ih_emb + (b_ih + b_hh) precomputed for all t outside.
        gates = (embg_ref[t]
                 + jnp.dot(context.astype(jnp.bfloat16), wic_ref[...],
                           preferred_element_type=jnp.float32)
                 + jnp.dot(h_bf, whh_ref[...],
                           preferred_element_type=jnp.float32))  # (Bp, 4Hp)
        i_g = jax.nn.sigmoid(gates[:, 0 * Hp:1 * Hp])
        f_g = jax.nn.sigmoid(gates[:, 1 * Hp:2 * Hp])
        g_g = jnp.tanh(gates[:, 2 * Hp:3 * Hp])
        o_g = jax.nn.sigmoid(gates[:, 3 * Hp:4 * Hp])
        cell_new = f_g * cell + i_g * g_g
        hidden_new = o_g * jnp.tanh(cell_new)

        hid_ref[t] = hidden_new                      # (Bp, Hp) lane-dense store
        return hidden_new, cell_new

    h0 = jnp.zeros((Bp, Hp), jnp.float32)
    c0 = jnp.zeros((Bp, Hp), jnp.float32)
    # Small static T: unroll so the LLO scheduler overlaps adjacent steps' work.
    lax.fori_loop(0, T, step, (h0, c0), unroll=True)


# ----------------------------------------------------------------------------
# Full forward (glue: padding / im2col / embedding gather / un-padding).
# ----------------------------------------------------------------------------
def encoder_decoder_forward(images, captions, enc_params, dec_params, *, k=4):
    conv_w, conv_b = enc_params
    (W_w, W_b, U_w, U_b, v_w, v_b, embed_tbl,
     W_ih, b_ih, W_hh, b_hh, fcn_w, fcn_b) = dec_params
    del v_b  # softmax over L is shift-invariant to the scalar v bias

    B, C, Himg, Wimg = images.shape
    F = conv_w.shape[1]
    A = W_w.shape[1]
    H = W_hh.shape[0]
    V = fcn_w.shape[1]
    E = embed_tbl.shape[1]
    T = captions.shape[1] - 1
    Ho, Wo = Himg // k, Wimg // k
    L = Ho * Wo

    # lane / sublane padding targets
    Bp = _round_up(max(B, 8), 8)
    Fp = _round_up(F, 128)
    Ap = _round_up(A, 128)
    Hp = _round_up(H, 128)
    Vp = _round_up(V, 128)
    bf16 = jnp.bfloat16

    # ---- encoder: im2col in glue, tiled Pallas matmul ----------------------
    imgs = _pad_axis(images, 0, Bp)                           # zero-pad batch
    x = jnp.transpose(imgs, (0, 2, 3, 1))                     # NCHW -> NHWC
    x = x.reshape(Bp, Ho, k, Wo, k, C).transpose(0, 1, 3, 2, 4, 5)
    patches = x.reshape(Bp * L, k * k * C).astype(bf16)       # (M, P)

    conv_w_p = _pad_axis(conv_w, 1, Fp).astype(bf16)          # (P, Fp)
    conv_b_p = _pad_axis(conv_b, 1, Fp).astype(jnp.float32)   # (1, Fp)
    feats_flat = matmul_bias(patches, conv_w_p, conv_b_p,
                             out_dtype=bf16)                  # (Bp*L, Fp)

    # ---- hoisted, time-invariant attention projection W(features)+b --------
    # Stored bf16 (halves residency / per-step load traffic); the add with uh
    # inside the kernel happens in f32.
    W_w_p = _pad_axis(_pad_axis(W_w, 0, Fp), 1, Ap).astype(bf16)
    W_b_p = _pad_axis(W_b, 1, Ap).astype(jnp.float32)
    wf_flat = matmul_bias(feats_flat, W_w_p, W_b_p,
                          out_dtype=bf16)                     # (Bp*L, Ap)

    feats = feats_flat.reshape(Bp, L, Fp)
    wf = wf_flat.reshape(Bp, L, Ap)

    # ---- embeddings -> precomputed gate contribution (one big matmul) ------
    ids_tb = jnp.transpose(captions[:, :-1], (1, 0))          # (T, B) int32
    emb = jnp.take(embed_tbl, ids_tb, axis=0)                 # (T, B, E)
    emb = _pad_axis(emb, 1, Bp).astype(bf16)                  # (T, Bp, E)

    Wie = _pad_gates(W_ih[:E], H, Hp).astype(bf16)            # (E, 4Hp)
    b_gate = _pad_gates(b_ih + b_hh, H, Hp).astype(jnp.float32)   # (1, 4Hp)
    embg_flat = matmul_bias(emb.reshape(T * Bp, E), Wie, b_gate,
                            out_dtype=jnp.float32)            # (T*Bp, 4Hp)
    embg = embg_flat.reshape(T, Bp, 4 * Hp)

    # ---- remaining decoder weights ------------------------------------------
    U_w_p = _pad_axis(_pad_axis(U_w, 0, Hp), 1, Ap).astype(bf16)
    U_b_p = _pad_axis(U_b, 1, Ap).astype(jnp.float32)
    v_row = _pad_axis(jnp.transpose(v_w, (1, 0)), 1, Ap).astype(jnp.float32)
    Wic = _pad_gates(_pad_axis(W_ih[E:], 0, Fp), H, Hp).astype(bf16)  # (Fp, 4Hp)
    Whh = _pad_gates(_pad_axis(W_hh, 0, Hp), H, Hp).astype(bf16)      # (Hp, 4Hp)

    # ---- recurrent decoder: single invocation, whole T loop in-kernel ------
    hid_out = pl.pallas_call(
        _decoder_kernel,
        out_shape=jax.ShapeDtypeStruct((T, Bp, Hp), jnp.float32),
        compiler_params=pltpu.CompilerParams(
            vmem_limit_bytes=32 * 1024 * 1024),
    )(embg, feats, wf, U_w_p, U_b_p, v_row, Wic, Whh)

    # ---- deferred vocab projection: one big tiled matmul --------------------
    # TODO(synk): nn.Dropout is treated as identity (eval-mode semantics).
    fcn_w_p = _pad_axis(_pad_axis(fcn_w, 0, Hp), 1, Vp).astype(bf16)
    fcn_b_p = _pad_axis(fcn_b, 1, Vp).astype(jnp.float32)
    logits_flat = matmul_bias(hid_out.reshape(T * Bp, Hp).astype(bf16),
                              fcn_w_p, fcn_b_p,
                              out_dtype=jnp.float32)          # (T*Bp, Vp)
    out_tbv = logits_flat.reshape(T, Bp, Vp)

    # un-pad: (T, Bp, Vp) -> (B, T, V) like PyTorch
    return jnp.transpose(out_tbv, (1, 0, 2))[:B, :, :V]


# ----------------------------------------------------------------------------
# Driver
# ----------------------------------------------------------------------------
if __name__ == "__main__":
    key = jax.random.PRNGKey(0)
    B, C, Himg, Wimg = 2, 3, 16, 16
    k = 4                         # encoder downsample factor -> L = 4*4 = 16
    feature_dim = 64              # small stand-in for ResNet50's 2048
    embed_size = 32
    hidden_size = 32
    attn_dim = 32
    vocab_size = 40
    seq_len = 9                   # captions length -> T = 8 decode steps

    keys = jax.random.split(key, 16)
    s = 0.1
    images = jax.random.normal(keys[0], (B, C, Himg, Wimg), jnp.float32)
    captions = jax.random.randint(keys[1], (B, seq_len), 0, vocab_size,
                                  dtype=jnp.int32)

    # encoder stand-in conv weights (as patch-matmul): (k*k*C, feature_dim)
    conv_w = s * jax.random.normal(keys[2], (k * k * C, feature_dim), jnp.float32)
    conv_b = s * jax.random.normal(keys[3], (1, feature_dim), jnp.float32)

    # Bahdanau attention: W (feature->attn), U (hidden->attn), v (attn->1)
    W_w = s * jax.random.normal(keys[4], (feature_dim, attn_dim), jnp.float32)
    W_b = s * jax.random.normal(keys[5], (1, attn_dim), jnp.float32)
    U_w = s * jax.random.normal(keys[6], (hidden_size, attn_dim), jnp.float32)
    U_b = s * jax.random.normal(keys[7], (1, attn_dim), jnp.float32)
    v_w = s * jax.random.normal(keys[8], (attn_dim, 1), jnp.float32)
    v_b = s * jax.random.normal(keys[9], (1, 1), jnp.float32)

    # embedding + LSTMCell(embed+feature -> hidden) + output projection
    embed_tbl = s * jax.random.normal(keys[10], (vocab_size, embed_size), jnp.float32)
    W_ih = s * jax.random.normal(keys[11],
                                 (embed_size + feature_dim, 4 * hidden_size),
                                 jnp.float32)
    b_ih = s * jax.random.normal(keys[12], (1, 4 * hidden_size), jnp.float32)
    W_hh = s * jax.random.normal(keys[13], (hidden_size, 4 * hidden_size), jnp.float32)
    b_hh = s * jax.random.normal(keys[14], (1, 4 * hidden_size), jnp.float32)
    fcn_w = s * jax.random.normal(keys[15], (hidden_size, vocab_size), jnp.float32)
    fcn_b = jnp.zeros((1, vocab_size), jnp.float32)

    enc_params = (conv_w, conv_b)
    dec_params = (W_w, W_b, U_w, U_b, v_w, v_b, embed_tbl,
                  W_ih, b_ih, W_hh, b_hh, fcn_w, fcn_b)

    out = encoder_decoder_forward(images, captions, enc_params, dec_params, k=k)
    jax.block_until_ready(out)
    assert out.shape == (B, seq_len - 1, vocab_size), out.shape
    print("KERNEL_OK")
</pallas_src>

<mosaic_0001>
module attributes {stable_mosaic.version = 11 : i64} {
  func.func @_matmul_bias_kernel(%arg0: i32, %arg1: i32, %arg2: memref<128x48xbf16, #tpu.memory_space<vmem>>, %arg3: memref<48x128xbf16, #tpu.memory_space<vmem>>, %arg4: memref<1x128xf32, #tpu.memory_space<vmem>>, %arg5: memref<128x128xbf16, #tpu.memory_space<vmem>>) attributes {dimension_semantics = [#tpu.dimension_semantics<parallel>, #tpu.dimension_semantics<parallel>], iteration_bounds = array<i64: 1, 1>, scalar_prefetch = 0 : i64, scratch_operands = 0 : i64, tpu.core_type = #tpu.core_type<tc>, window_params = [{transform_indices = @transform_0, window_bounds = array<i64: 128, 48>}, {transform_indices = @transform_1, window_bounds = array<i64: 48, 128>}, {transform_indices = @transform_2, window_bounds = array<i64: 1, 128>}, {transform_indices = @transform_3, window_bounds = array<i64: 128, 128>}]} {
    %c0 = arith.constant 0 : index
    %c0_0 = arith.constant 0 : index
    %0 = vector.load %arg2[%c0, %c0_0] : memref<128x48xbf16, #tpu.memory_space<vmem>>, vector<128x48xbf16>
    %c0_1 = arith.constant 0 : index
    %c0_2 = arith.constant 0 : index
    %1 = vector.load %arg3[%c0_1, %c0_2] : memref<48x128xbf16, #tpu.memory_space<vmem>>, vector<48x128xbf16>
    %cst = arith.constant dense<0.000000e+00> : vector<128x128xf32>
    %2 = tpu.matmul %0, %1, %cst {dimension_numbers = #tpu.dot_dimension_numbers<[1], [0], [0], [1], [0, 0, 1, 1], [], []>} : vector<128x48xbf16>, vector<48x128xbf16>, vector<128x128xf32> -> vector<128x128xf32>
    %c0_3 = arith.constant 0 : index
    %c0_4 = arith.constant 0 : index
    %3 = vector.load %arg4[%c0_3, %c0_4] : memref<1x128xf32, #tpu.memory_space<vmem>>, vector<1x128xf32>
    %4 = vector.broadcast %3 : vector<1x128xf32> to vector<128x128xf32>
    %5 = arith.addf %2, %4 : vector<128x128xf32>
    %6 = arith.truncf %5 : vector<128x128xf32> to vector<128x128xbf16>
    %c0_5 = arith.constant 0 : index
    %c0_6 = arith.constant 0 : index
    %7 = vector.load %arg5[%c0_5, %c0_6] : memref<128x128xbf16, #tpu.memory_space<vmem>>, vector<128x128xbf16>
    tpu.vector_store %arg5[%c0_5, %c0_6], %6 {strides = array<i32>} : memref<128x128xbf16, #tpu.memory_space<vmem>>, vector<128x128xbf16>,
    return
  }
  func.func @transform_0(%arg0: i32, %arg1: i32) -> (i32, i32) {
    %c0_i32 = arith.constant 0 : i32
    %c0_i32_0 = arith.constant 0 : i32
    return %arg0, %c0_i32 : i32, i32
  }
  func.func @transform_1(%arg0: i32, %arg1: i32) -> (i32, i32) {
    %c0_i32 = arith.constant 0 : i32
    %c0_i32_0 = arith.constant 0 : i32
    return %c0_i32, %arg1 : i32, i32
  }
  func.func @transform_2(%arg0: i32, %arg1: i32) -> (i32, i32) {
    %c0_i32 = arith.constant 0 : i32
    %c0_i32_0 = arith.constant 0 : i32
    return %c0_i32, %arg1 : i32, i32
  }
  func.func @transform_3(%arg0: i32, %arg1: i32) -> (i32, i32) {
    %c0_i32 = arith.constant 0 : i32
    return %arg0, %arg1 : i32, i32
  }
}

</mosaic_0001>

<bundles_post_ra>
// kernel: tpu_custom_call.1
= control target key start
LH: loop header
LB: loop body
LE: loop exit
PB: predicated region body
PF: predicated region fallthrough
CT: control target
= control target key end

     0   :  { %s443_s0 = inlined_call_operand.vmem [shape: bf16[128,48], index: 0, kind: input, shape index: {}]   ;;  %s444_s1 = inlined_call_operand.vmem [shape: bf16[48,128], index: 1, kind: input, shape index: {}]   ;;  %s445_s2 = inlined_call_operand.vmem [shape: f32[1,128], index: 2, kind: input, shape index: {}]   ;;  %s446_s3 = inlined_call_operand.hbm [shape: bf16[128,128], index: 3, kind: output, shape index: {}]  }
   0x1   :  { %v286_v0 = vld [vmem:[%s444_s1 + $0x10] sm:$0xff]  ;;  %v285_v1 = vld [vmem:[%s444_s1 + $0x8] sm:$0xff] }
   0x2   :  { %130 = vmatpush.bf16.msra.mxu0 %v286_v0  ;;  %334 = vmatpush.bf16.msra.mxu1 %v286_v0 }
   0x3   :  { %335 = vmatpush.bf16.msra.mxu2 %v286_v0  ;;  %336 = vmatpush.bf16.msra.mxu3 %v286_v0 }
   0x4   :  { %8 = vsyncpa [#allocation3], 0  ;;  %v284_v2 = vld [vmem:[%s444_s1] sm:$0xff]  ;;  %v278_v4 = vld [vmem:[%s443_s0 + $0x10] sm:$0xff]  ;;  %vm100_vm0 = vcmask 392192   ;;  %s212_s10 = sshll.u32 %s446_s3, 4  ;;  %s213_s10 = int_to_ptr.hbm [resolvable:$true] %s212_s10 }
   0x5   :  { %v276_v3 = vld [vmem:[%s443_s0] sm:$0xff]  ;;  %v282_v6 = vld [vmem:[%s443_s0 + $0x30] sm:$0xff]  ;;  %v277_v7 = vld [vmem:[%s443_s0 + $0x8] sm:$0xff]  ;;  %s374_s11 = smov 64   ;;  %s375_s12 = smov 4  }
   0x6   :  { %131 = vmatpush.bf16.msra.mxu0 %v285_v1  ;;  %337 = vmatpush.bf16.msra.mxu1 %v285_v1  ;;  %v280_v5 = vld [vmem:[%s443_s0 + $0x20] sm:$0xff]  ;;  %v279_v8 = vld [vmem:[%s443_s0 + $0x18] sm:$0xff]  ;;  %v281_v9 = vld [vmem:[%s443_s0 + $0x28] sm:$0xff] }
   0x7   :  { %338 = vmatpush.bf16.msra.mxu2 %v285_v1  ;;  %339 = vmatpush.bf16.msra.mxu3 %v285_v1  ;;  %v283_v10 = vld [vmem:[%s443_s0 + $0x38] sm:$0xff]  ;;  %v346_v13 = vld [vmem:[%s445_s2] ss:$0 sm:$0xff]  ;;  %s373_s0 = smov [#allocation2]  }
   0x8   :  { %s210_s2 = sshll.u32 %s373_s0, 4  ;;  %s211_s2 = int_to_ptr.vmem [resolvable:$true] %s210_s2 }
   0xa   :  { %132 = vmatpush.bf16.msra.mxu0 %v284_v2  ;;  %340 = vmatpush.bf16.msra.mxu1 %v284_v2 }
   0xb   :  { %341 = vmatpush.bf16.msra.mxu2 %v284_v2  ;;  %342 = vmatpush.bf16.msra.mxu3 %v284_v2 }
   0xd   :  { %268 = vmatmul.msk.bf16.vlgmr.msra.gmra.mxu0 %vm100_vm0, %v276_v3  ;;  %270 = vmatmul.msk.bf16.vlgmr.msra.gmra.mxu1 %vm100_vm0, %v278_v4 }
   0xe   :  { %272 = vmatmul.msk.bf16.vlgmr.msra.gmra.mxu2 %vm100_vm0, %v280_v5  ;;  %274 = vmatmul.msk.bf16.vlgmr.msra.gmra.mxu3 %vm100_vm0, %v282_v6 }
  0x1d   :  { %269 = vmatmul.msk.bf16.gmra.mxu0 %vm100_vm0, %v277_v7  ;;  %271 = vmatmul.msk.bf16.gmra.mxu1 %vm100_vm0, %v279_v8 }
  0x1e   :  { %273 = vmatmul.msk.bf16.gmra.mxu2 %vm100_vm0, %v281_v9  ;;  %275 = vmatmul.msk.bf16.gmra.mxu3 %vm100_vm0, %v283_v10 }
  0x8a   :  { %v134_v11 = vpop.f32.mrf.mxu0  ;;  %v144_v12 = vpop.f32.mrf.mxu1 }
  0x8b   :  { %v135_v18 = vadd.f32 %v346_v13, %v134_v11  ;;  %v145_v19 = vadd.f32 %v346_v13, %v144_v12 }
  0x91   :  { %v154_v14 = vpop.f32.mrf.mxu2  ;;  %v164_v15 = vpop.f32.mrf.mxu3 }
  0x92   :  { %v136_v16 = vpop.f32.mrf.mxu0  ;;  %v146_v17 = vpop.f32.mrf.mxu1  ;;  %v155_v26 = vadd.f32 %v346_v13, %v154_v14  ;;  %v165_v27 = vadd.f32 %v346_v13, %v164_v15 }
  0x93   :  { %v137_v20 = vadd.f32 %v346_v13, %v136_v16  ;;  %v147_v21 = vadd.f32 %v346_v13, %v146_v17 }
  0x95   :  { %v290_v22 = vpack.c.bf16 %v137_v20, %v135_v18  ;;  %v300_v23 = vpack.c.bf16 %v147_v21, %v145_v19 }
  0x97   :  { %291 = vst [vmem:[#allocation2] sm:$0xff] %v290_v22  }
  0x98   :  { %328 = vst [vmem:[#allocation2 + $0x10] sm:$0xff] %v300_v23  }
  0x99   :  { %v156_v24 = vpop.f32.mrf.mxu2  ;;  %v166_v25 = vpop.f32.mrf.mxu3 }
  0x9a   :  { %v157_v28 = vadd.f32 %v346_v13, %v156_v24  ;;  %v167_v29 = vadd.f32 %v346_v13, %v166_v25  ;;  %v139_v30 = vpop.f32.mrf.mxu0  ;;  %v149_v31 = vpop.f32.mrf.mxu1 }
  0x9b   :  { %v140_v38 = vadd.f32 %v346_v13, %v139_v30  ;;  %v150_v39 = vadd.f32 %v346_v13, %v149_v31 }
  0x9c   :  { %v310_v32 = vpack.c.bf16 %v157_v28, %v155_v26  ;;  %v320_v33 = vpack.c.bf16 %v167_v29, %v165_v27 }
  0x9e   :  { %330 = vst [vmem:[#allocation2 + $0x20] sm:$0xff] %v310_v32  }
  0x9f   :  { %332 = vst [vmem:[#allocation2 + $0x30] sm:$0xff] %v320_v33  }
  0xa1   :  { %v159_v34 = vpop.f32.mrf.mxu2  ;;  %v169_v35 = vpop.f32.mrf.mxu3 }
  0xa2   :  { %v141_v36 = vpop.f32.mrf.mxu0  ;;  %v151_v37 = vpop.f32.mrf.mxu1  ;;  %v160_v46 = vadd.f32 %v346_v13, %v159_v34  ;;  %v170_v47 = vadd.f32 %v346_v13, %v169_v35 }
  0xa3   :  { %v142_v40 = vadd.f32 %v346_v13, %v141_v36  ;;  %v152_v41 = vadd.f32 %v346_v13, %v151_v37 }
  0xa5   :  { %v295_v42 = vpack.c.bf16 %v142_v40, %v140_v38  ;;  %v305_v43 = vpack.c.bf16 %v152_v41, %v150_v39 }
  0xa7   :  { %327 = vst [vmem:[#allocation2 + $0x8] sm:$0xff] %v295_v42  }
  0xa8   :  { %329 = vst [vmem:[#allocation2 + $0x18] sm:$0xff] %v305_v43  }
  0xa9   :  { %v161_v44 = vpop.f32.mrf.mxu2  ;;  %v171_v45 = vpop.f32.mrf.mxu3 }
  0xaa   :  { %v162_v48 = vadd.f32 %v346_v13, %v161_v44  ;;  %v172_v49 = vadd.f32 %v346_v13, %v171_v45 }
  0xac   :  { %v315_v50 = vpack.c.bf16 %v162_v48, %v160_v46  ;;  %v325_v51 = vpack.c.bf16 %v172_v49, %v170_v47 }
  0xae   :  { %331 = vst [vmem:[#allocation2 + $0x28] sm:$0xff] %v315_v50  }
  0xaf   :  { %333 = vst [vmem:[#allocation2 + $0x38] sm:$0xff] %v325_v51  }
  0xb0   :  { %218 = dma.vmem_to_hbm [thread:$0]  %s211_s2, 1024, %s213_s10, [#allocation3], %s374_s11, %s374_s11, %s375_s12  }
  0xb1   :  { %371 = dma.done.wait [#allocation3], 1024  }
  0xb2   :  { %372 = vsyncadd [#allocation3], 4294966272 }
  0xb3   :  { %223 = vsyncpa [#allocation3], 1 }

</bundles_post_ra>
